<compile_context>
chip_gen: v5e
topology: v5e:2x2
jax: 0.10.0
libtpu: 0.0.40
codegen_flags: <defaults>
</compile_context>

<pallas_src>
import math

import jax
import jax.numpy as jnp
from jax.experimental import pallas as pl
from jax.experimental.pallas import tpu as pltpu

_LOG2 = math.log(2.0)          # trace-time constant (hoisted, never re-broadcast)
_LANES = 1024                  # 8 * 128 -> lane-dense, unmasked vector stores
_MAX_BLOCK_ROWS = 512          # 512 x 1024 f32 = 2 MiB per block buffer


def _mod_softplus_kernel(x_ref, o_ref):
    """Elementwise: softplus(x) + x/2 - log(2), computed in f32."""
    x = x_ref[...].astype(jnp.float32)
    # Numerically stable softplus: max(x, 0) + log1p(exp(-|x|))  (exp/log1p -> EUP)
    sp = jnp.maximum(x, 0.0) + jnp.log1p(jnp.exp(-jnp.abs(x)))
    o_ref[...] = (sp + 0.5 * x - _LOG2).astype(o_ref.dtype)


def _round_up(v, m):
    return (v + m - 1) // m * m


def mod_softplus_forward(x, *, lanes=_LANES, max_block_rows=_MAX_BLOCK_ROWS):
    """Applies mod_softplus elementwise to an array of any shape/size."""
    orig_shape = x.shape
    orig_dtype = x.dtype

    flat = x.reshape(-1).astype(jnp.float32)
    n = flat.shape[0]

    # Lay the data out as (rows, lanes) with lanes a multiple of 128.
    rows = max(pl.cdiv(n, lanes), 1)
    if rows <= max_block_rows:
        block_rows = rows          # block == full array dim -> always legal
        grid_rows = 1
    else:
        block_rows = max_block_rows
        rows = _round_up(rows, block_rows)
        grid_rows = rows // block_rows

    padded_n = rows * lanes
    if padded_n != n:
        flat = jnp.pad(flat, (0, padded_n - n))   # glue: layout padding only
    x2d = flat.reshape(rows, lanes)

    out2d = pl.pallas_call(
        _mod_softplus_kernel,
        out_shape=jax.ShapeDtypeStruct((rows, lanes), jnp.float32),
        grid_spec=pltpu.PrefetchScalarGridSpec(
            num_scalar_prefetch=0,
            grid=(grid_rows,),
            in_specs=[pl.BlockSpec((block_rows, lanes), lambda i: (i, 0))],
            out_specs=pl.BlockSpec((block_rows, lanes), lambda i: (i, 0)),
        ),
        compiler_params=pltpu.CompilerParams(
            dimension_semantics=("parallel",),
        ),
        cost_estimate=pl.CostEstimate(
            flops=4 * padded_n,              # max, log1p-add, mul, adds (rough)
            transcendentals=2 * padded_n,    # exp + log1p per element
            bytes_accessed=2 * padded_n * 4, # read + write, f32
        ),
    )(x2d)

    out = out2d.reshape(-1)[:n].reshape(orig_shape)
    return out.astype(orig_dtype)


def _ref_mod_softplus(x):
    x32 = x.astype(jnp.float32)
    return (jax.nn.softplus(x32) + 0.5 * x32 - _LOG2).astype(x.dtype)


if __name__ == "__main__":
    key = jax.random.PRNGKey(0)
    k1, k2 = jax.random.split(key)

    # Small 4-D input consistent with an elementwise activation module.
    x = jax.random.normal(k1, (2, 4, 16, 16), dtype=jnp.float32) * 4.0

    out = jax.block_until_ready(mod_softplus_forward(x))
    ref = _ref_mod_softplus(x)
    assert out.shape == x.shape
    assert jnp.allclose(out, ref, atol=1e-5, rtol=1e-5), "mismatch vs reference"

    # Odd-sized input: exercises the padding + slice-off path.
    y = jax.random.normal(k2, (3, 5, 7, 11), dtype=jnp.float32) * 3.0
    out_y = jax.block_until_ready(mod_softplus_forward(y))
    assert jnp.allclose(out_y, _ref_mod_softplus(y), atol=1e-5, rtol=1e-5), \
        "mismatch vs reference (odd shape)"

    # Small-tile override: exercises the multi-block (grid > 1) pipelined path.
    out_tiled = jax.block_until_ready(
        mod_softplus_forward(x, lanes=128, max_block_rows=8))
    assert jnp.allclose(out_tiled, ref, atol=1e-5, rtol=1e-5), \
        "mismatch vs reference (tiled path)"

    print("KERNEL_OK")
</pallas_src>

<mosaic_0001>
module attributes {stable_mosaic.version = 11 : i64} {
  func.func @_mod_softplus_kernel(%arg0: i32, %arg1: memref<2x1024xf32, #tpu.memory_space<vmem>>, %arg2: memref<2x1024xf32, #tpu.memory_space<vmem>>) attributes {dimension_semantics = [#tpu.dimension_semantics<parallel>], iteration_bounds = array<i64: 1>, scalar_prefetch = 0 : i64, scratch_operands = 0 : i64, tpu.core_type = #tpu.core_type<tc>, window_params = [{transform_indices = @transform_0, window_bounds = array<i64: 2, 1024>}, {transform_indices = @transform_1, window_bounds = array<i64: 2, 1024>}]} {
    %c0 = arith.constant 0 : index
    %c0_0 = arith.constant 0 : index
    %0 = vector.load %arg1[%c0, %c0_0] : memref<2x1024xf32, #tpu.memory_space<vmem>>, vector<2x1024xf32>
    %cst = arith.constant 0.000000e+00 : f32
    %1 = vector.broadcast %cst : f32 to vector<2x1024xf32>
    %2 = arith.maximumf %0, %1 : vector<2x1024xf32>
    %3 = math.absf %0 : vector<2x1024xf32>
    %cst_1 = arith.constant 0.000000e+00 : f32
    %4 = vector.broadcast %cst_1 : f32 to vector<2x1024xf32>
    %5 = arith.subf %4, %3 : vector<2x1024xf32>
    %6 = math.exp %5 : vector<2x1024xf32>
    %7 = math.log1p %6 : vector<2x1024xf32>
    %8 = arith.addf %2, %7 : vector<2x1024xf32>
    %cst_2 = arith.constant 5.000000e-01 : f32
    %9 = vector.broadcast %cst_2 : f32 to vector<2x1024xf32>
    %10 = arith.mulf %9, %0 : vector<2x1024xf32>
    %11 = arith.addf %8, %10 : vector<2x1024xf32>
    %cst_3 = arith.constant 0.693147182 : f32
    %12 = vector.broadcast %cst_3 : f32 to vector<2x1024xf32>
    %13 = arith.subf %11, %12 : vector<2x1024xf32>
    %c0_4 = arith.constant 0 : index
    %c0_5 = arith.constant 0 : index
    %14 = vector.load %arg2[%c0_4, %c0_5] : memref<2x1024xf32, #tpu.memory_space<vmem>>, vector<2x1024xf32>
    tpu.vector_store %arg2[%c0_4, %c0_5], %13 {strides = array<i32>} : memref<2x1024xf32, #tpu.memory_space<vmem>>, vector<2x1024xf32>,
    return
  }
  func.func @transform_0(%arg0: i32) -> (i32, i32) {
    %c0_i32 = arith.constant 0 : i32
    %c0_i32_0 = arith.constant 0 : i32
    return %arg0, %c0_i32 : i32, i32
  }
  func.func @transform_1(%arg0: i32) -> (i32, i32) {
    %c0_i32 = arith.constant 0 : i32
    %c0_i32_0 = arith.constant 0 : i32
    return %arg0, %c0_i32 : i32, i32
  }
}

</mosaic_0001>

<bundles_post_ra>
// kernel: tpu_custom_call.1
= control target key start
LH: loop header
LB: loop body
LE: loop exit
PB: predicated region body
PF: predicated region fallthrough
CT: control target
= control target key end

     0   :  { %6 = vsyncpa [#allocation3], 0  ;;  %s162_s0 = inlined_call_operand.hbm [shape: f32[2,1024], index: 0, kind: input, shape index: {}]   ;;  %s163_s1 = inlined_call_operand.hbm [shape: f32[2,1024], index: 1, kind: output, shape index: {}]  }
   0x1   :  { %7 = vsyncpa [#allocation4], 0  ;;  %s13_s8 = sshll.u32 %s162_s0, 4  ;;  %s144_s9 = smov [#allocation2]   ;;  %s14_s8 = int_to_ptr.hbm [resolvable:$true] %s13_s8 }
   0x2   :  { %s15_s10 = sshll.u32 %s144_s9, 4  ;;  %s16_s10 = int_to_ptr.vmem [resolvable:$true] %s15_s10 }
   0x3   :  { %18 = dma.hbm_to_vmem [thread:$0]  %s14_s8, 256, %s16_s10, [#allocation3]  }
   0x4   :  { %140 = dma.done.wait [#allocation3], 256  }
   0x5   :  { %141 = vsyncadd [#allocation3], 4294967040  ;;  %v23_v0 = vld [vmem:[#allocation2] sm:$0xff]  ;;  %v24_v1 = vld [vmem:[#allocation2 + $0x8] sm:$0xff]  ;;  %s145_s0 = smov [#allocation5]   ;;  %s70_s14 = sshll.u32 %s163_s1, 4  ;;  %s71_s14 = int_to_ptr.hbm [resolvable:$true] %s70_s14 }
   0x6   :  { %v27_v2 = vand.u32 2147483647, %v23_v0  ;;  %v28_v3 = vand.u32 2147483647, %v24_v1  ;;  %v25_v20 = vmax.f32 %v23_v0, 0.0  ;;  %v26_v24 = vmax.f32 %v24_v1, 0.0 }
   0x7   :  { %v55_v25 = vmul.f32 0.5, %v23_v0  ;;  %v56_v28 = vmul.f32 0.5, %v24_v1  ;;  %s68_s11 = sshll.u32 %s145_s0, 4  ;;  %s69_s11 = int_to_ptr.vmem [resolvable:$true] %s68_s11 }
   0x8   :  { %v29_v4 = vsub.f32 0.0, %v27_v2  ;;  %v30_v5 = vsub.f32 0.0, %v28_v3 }
   0xa   :  { %v31_v6 = vmul.f32 1.442695, %v29_v4  ;;  %v33_v7 = vmul.f32 1.442695, %v30_v5 }
   0xc   :  { %84 = vpow2.f32 %v31_v6 }
   0xd   :  { %86 = vpow2.f32 %v33_v7 }
  0x12   :  { %v85_v8 = vpop.eup %84 }
  0x13   :  { %v87_v9 = vpop.eup %86  ;;  %v35_v10 = vadd.f32 1.0, %v85_v8  ;;  %v38_v11 = vmul.f32 -0.5, %v85_v8  ;;  %v41_v15 = vand.u32 2147483647, %v85_v8 }
  0x14   :  { %v44_v12 = vadd.f32 1.0, %v87_v9  ;;  %v47_v13 = vmul.f32 -0.5, %v87_v9  ;;  %v50_v17 = vand.u32 2147483647, %v87_v9 }
  0x15   :  { %88 = vlog2.f32 %v35_v10  ;;  %v39_v14 = vadd.f32 1.0, %v38_v11  ;;  %vm42_vm0 = vcmp.lt.f32.partialorder %v41_v15, 0.0004427343 }
  0x16   :  { %90 = vlog2.f32 %v44_v12  ;;  %v48_v16 = vadd.f32 1.0, %v47_v13  ;;  %vm51_vm1 = vcmp.lt.f32.partialorder %v50_v17, 0.0004427343 }
  0x17   :  { %v40_v18 = vmul.f32 %v85_v8, %v39_v14 }
  0x18   :  { %v49_v21 = vmul.f32 %v87_v9, %v48_v16 }
  0x1b   :  { %v89_v19 = vpop.eup %88 }
  0x1c   :  { %v91_v22 = vpop.eup %90  ;;  %v37_v23 = vmul.f32 0.6931472, %v89_v19 }
  0x1d   :  { %v46_v26 = vmul.f32 0.6931472, %v91_v22 }
  0x1e   :  { %v43_v27 = vsel %vm42_vm0, %v40_v18, %v37_v23 }
  0x1f   :  { %v53_v29 = vadd.f32 %v43_v27, %v25_v20  ;;  %v52_v30 = vsel %vm51_vm1, %v49_v21, %v46_v26 }
  0x20   :  { %v54_v31 = vadd.f32 %v52_v30, %v26_v24 }
  0x21   :  { %v57_v32 = vadd.f32 %v55_v25, %v53_v29 }
  0x22   :  { %v58_v33 = vadd.f32 %v56_v28, %v54_v31 }
  0x23   :  { %v80_v34 = vadd.f32 -0.6931472, %v57_v32 }
  0x24   :  { %v81_v35 = vadd.f32 -0.6931472, %v58_v33 }
  0x25   :  { %61 = vst [vmem:[#allocation5] sm:$0xff] %v80_v34 }
  0x26   :  { %62 = vst [vmem:[#allocation5 + $0x8] sm:$0xff] %v81_v35 }
  0x27   :  { %73 = dma.vmem_to_hbm [thread:$0]  %s69_s11, 256, %s71_s14, [#allocation4]  }
  0x28   :  { %142 = dma.done.wait [#allocation4], 256  }
  0x29   :  { %143 = vsyncadd [#allocation4], 4294967040 }
  0x2a   :  { %78 = vsyncpa [#allocation3], 1 }
  0x2b   :  { %79 = vsyncpa [#allocation4], 1 }

</bundles_post_ra>
